<compile_context>
chip_gen: v5e
topology: v5e:2x2
jax: 0.10.0
libtpu: 0.0.40
codegen_flags: <defaults>
</compile_context>

<pallas_src>
import functools

import jax
import jax.numpy as jnp
from jax.experimental import pallas as pl
from jax.experimental.pallas import tpu as pltpu


def odefunc_kernel(x_ref, g2_ref, w1_ref, b1_ref, w2_ref, b2_ref,
                   f_ref, acc_ref, *, tm, tk):
    i = pl.program_id(0)
    k = pl.program_id(1)

    @pl.when(k == 0)
    def _init():
        acc_ref[...] = jnp.zeros_like(acc_ref)

    # One (row-tile x col-tile) contribution of g2 @ x on the MXU.
    # g2 is bf16; cast the resident-x column slice to match (f32 accumulation).
    col0 = pl.multiple_of(k * tk, tk)
    x_cols = x_ref[pl.ds(col0, tk), :].astype(g2_ref.dtype)
    acc_ref[...] += jnp.dot(g2_ref[...], x_cols,
                            preferred_element_type=jnp.float32)

    @pl.when(k == pl.num_programs(1) - 1)
    def _finalize():
        row0 = pl.multiple_of(i * tm, tm)
        x_rows = x_ref[pl.ds(row0, tm), :].astype(jnp.float32)

        # alph = sigmoid(linear2_u_1(linear2_u(x))) for this row tile.
        h = jnp.dot(x_rows, w1_ref[...],
                    preferred_element_type=jnp.float32) + b1_ref[...]
        # 1-wide-output matmul replaced by a VPU/XLU lane reduction.
        z = jnp.sum(h * w2_ref[...], axis=-1, keepdims=True) + b2_ref[0, 0]
        alph = jax.nn.sigmoid(z)                                   # [tm, 1]

        f_ref[...] = (alph * acc_ref[...] - x_rows).astype(f_ref.dtype)


def precompute_g2(g, dtype=jnp.bfloat16):
    """g is constant across solver steps: compute g @ g once, store compactly."""
    g2 = jnp.dot(g, g, preferred_element_type=jnp.float32,
                 precision=jax.lax.Precision.HIGHEST)
    return g2.astype(dtype)


def _round_up(n, m):
    return ((n + m - 1) // m) * m


def _vmem_limit_bytes():
    # Generation-aware: v7x has 64 MiB physical VMEM vs 128 MiB on v5e/v6e.
    try:
        phys = int(pltpu.get_tpu_info().vmem_capacity_bytes)
    except Exception:
        phys = 64 * 1024 * 1024  # conservative fallback, safe on every generation
    return int(min(phys * 0.7, 100 * 1024 * 1024))


def odefunc_forward(g2, x, w1, b1, w2_row, b2, *, tm=None, tk=None):
    """f = sigmoid((x@W1+b1)@w2+b2) * (g2 @ x) - x, with g2 = g @ g (bf16)."""
    N, D = x.shape
    Dh = w1.shape[1]

    if tm is None:
        # Row tile: big enough to amortize per-step overhead, but keep >= 2 row
        # tiles so both v7x TensorCores get work on the "parallel" axis.
        tm = min(1024, pl.next_power_of_2(pl.cdiv(N, 2)))
    if tk is None:
        # Streamed g2 reduction tile: as large as practical (amortizes ~0.35us/step).
        tk = min(2048, pl.next_power_of_2(N))
    tm = max(8, min(tm, _round_up(N, 8)))
    tk = max(128, min(tk, _round_up(N, 128)))
    assert tm % 8 == 0 and tk % 128 == 0, "tile sizes must respect (8,128) tiling"

    np_rows = _round_up(N, tm)
    np_cols = _round_up(N, tk)
    n_pad = max(np_rows, np_cols)

    # Zero-pad tail tiles (zero g2 columns contribute nothing; extra rows dropped).
    x_p = x if n_pad == N else jnp.pad(x, ((0, n_pad - N), (0, 0)))
    if g2.shape == (np_rows, np_cols):
        g2_p = g2
    else:
        g2_p = jnp.pad(g2, ((0, np_rows - g2.shape[0]), (0, np_cols - g2.shape[1])))

    grid = (np_rows // tm, np_cols // tk)

    cost = pl.CostEstimate(
        flops=2 * np_rows * np_cols * D + 2 * np_rows * D * Dh,
        transcendentals=np_rows,
        bytes_accessed=(np_rows * np_cols * g2_p.dtype.itemsize
                        + 2 * n_pad * D * x.dtype.itemsize),
    )

    kernel = functools.partial(odefunc_kernel, tm=tm, tk=tk)

    out = pl.pallas_call(
        kernel,
        out_shape=jax.ShapeDtypeStruct((np_rows, D), x.dtype),
        grid_spec=pltpu.PrefetchScalarGridSpec(
            num_scalar_prefetch=0,
            grid=grid,
            in_specs=[
                pl.BlockSpec((n_pad, D), lambda i, k: (0, 0)),       # x, resident
                pl.BlockSpec((tm, tk), lambda i, k: (i, k)),         # g2 tile (bf16, streamed)
                pl.BlockSpec((D, Dh), lambda i, k: (0, 0)),          # W1 (resident)
                pl.BlockSpec((1, Dh), lambda i, k: (0, 0)),          # b1
                pl.BlockSpec((1, Dh), lambda i, k: (0, 0)),          # w2 as a row vector
                pl.BlockSpec(memory_space=pltpu.MemorySpace.SMEM),   # b2 scalar
            ],
            out_specs=pl.BlockSpec((tm, D), lambda i, k: (i, 0)),
            scratch_shapes=[pltpu.VMEM((tm, D), jnp.float32)],
        ),
        compiler_params=pltpu.CompilerParams(
            dimension_semantics=("parallel", "arbitrary"),
            vmem_limit_bytes=_vmem_limit_bytes(),
        ),
        cost_estimate=cost,
    )(x_p, g2_p, w1, b1, w2_row, b2)

    return out[:N] if np_rows != N else out


def odefunc_reference(g, x, w1, b1, w2_row, b2):
    """Pure-JAX reference, matching the PyTorch module exactly (f32 math)."""
    h = x @ w1 + b1
    z = h @ w2_row.T + b2
    alph = jax.nn.sigmoid(z)
    ax = g @ x
    ax = alph * (g @ ax)
    return ax - x


if __name__ == "__main__":
    # Small shapes consistent with the module: N graph nodes, latent_dim features.
    N = 256         # number of graph nodes
    D = 32          # latent_dim
    Dh = D // 2     # hidden dim of linear2_u (non-cell-phone branch)

    key = jax.random.PRNGKey(0)
    k_g, k_x, k_w1, k_b1, k_w2, k_b2 = jax.random.split(key, 6)

    g = jax.random.uniform(k_g, (N, N), dtype=jnp.float32) * 0.1   # dense "adjacency"
    x = jax.random.normal(k_x, (N, D), dtype=jnp.float32)

    # nn.Linear(latent_dim, latent_dim//2): weight [Dh, D] -> stored transposed [D, Dh]
    w1 = jax.random.normal(k_w1, (D, Dh), dtype=jnp.float32) * 0.1
    b1 = jax.random.normal(k_b1, (1, Dh), dtype=jnp.float32) * 0.1
    # nn.Linear(latent_dim//2, 1): weight [1, Dh] kept as a row vector
    w2_row = jax.random.normal(k_w2, (1, Dh), dtype=jnp.float32) * 0.1
    b2 = jax.random.normal(k_b2, (1, 1), dtype=jnp.float32) * 0.1

    # One-time precompute (amortized over all ODEFunc evaluations in a solve),
    # stored in bf16 to halve the dominant HBM stream.
    g2 = precompute_g2(g)

    f_ref = odefunc_reference(g, x, w1, b1, w2_row, b2)

    # Small explicit tiles -> grid (2, 2): exercises both the parallel row axis
    # and the k-reduction accumulator.
    f = odefunc_forward(g2, x, w1, b1, w2_row, b2, tm=128, tk=128)
    jax.block_until_ready(f)
    assert f.shape == (N, D)
    # Tolerance covers bf16 g2 quantization + (g@g)@x vs g@(g@x) re-association.
    assert jnp.allclose(f, f_ref, atol=5e-2, rtol=5e-2), (
        float(jnp.max(jnp.abs(f - f_ref))))

    # Default (large-tile) path: grid (2, 1), same result.
    f2 = odefunc_forward(g2, x, w1, b1, w2_row, b2)
    jax.block_until_ready(f2)
    assert jnp.allclose(f2, f_ref, atol=5e-2, rtol=5e-2), (
        float(jnp.max(jnp.abs(f2 - f_ref))))

    print("KERNEL_OK")
</pallas_src>

<mosaic_0001>
module attributes {stable_mosaic.version = 11 : i64} {
  func.func @odefunc_kernel(%arg0: i32, %arg1: i32, %arg2: memref<256x32xf32, #tpu.memory_space<vmem>>, %arg3: memref<128x128xbf16, #tpu.memory_space<vmem>>, %arg4: memref<32x16xf32, #tpu.memory_space<vmem>>, %arg5: memref<1x16xf32, #tpu.memory_space<vmem>>, %arg6: memref<1x16xf32, #tpu.memory_space<vmem>>, %arg7: memref<1x1xf32, #tpu.memory_space<smem>>, %arg8: memref<128x32xf32, #tpu.memory_space<vmem>>, %arg9: memref<128x32xf32, #tpu.memory_space<vmem>>) attributes {dimension_semantics = [#tpu.dimension_semantics<parallel>, #tpu.dimension_semantics<arbitrary>], iteration_bounds = array<i64: 2, 2>, scalar_prefetch = 0 : i64, scratch_operands = 1 : i64, tpu.core_type = #tpu.core_type<tc>, window_params = [{pipeline_mode = #tpu.pipeline_mode<synchronous>, transform_indices = @transform_0, window_bounds = array<i64: 256, 32>}, {transform_indices = @transform_1, window_bounds = array<i64: 128, 128>}, {pipeline_mode = #tpu.pipeline_mode<synchronous>, transform_indices = @transform_2, window_bounds = array<i64: 32, 16>}, {pipeline_mode = #tpu.pipeline_mode<synchronous>, transform_indices = @transform_3, window_bounds = array<i64: 1, 16>}, {pipeline_mode = #tpu.pipeline_mode<synchronous>, transform_indices = @transform_4, window_bounds = array<i64: 1, 16>}, {transform_indices = @transform_5, window_bounds = array<i64: 1, 1>}, {transform_indices = @transform_6, window_bounds = array<i64: 128, 32>}]} {
    %c0_i32 = arith.constant 0 : i32
    %0 = arith.cmpi eq, %arg1, %c0_i32 : i32
    %1 = arith.extui %0 : i1 to i32
    %c0_i32_0 = arith.constant 0 : i32
    %2 = arith.cmpi ne, %1, %c0_i32_0 : i32
    scf.if %2 {
      %cst_8 = arith.constant 0.000000e+00 : f32
      %16 = vector.broadcast %cst_8 : f32 to vector<128x32xf32>
      %c0_9 = arith.constant 0 : index
      %c0_10 = arith.constant 0 : index
      %17 = vector.load %arg9[%c0_9, %c0_10] : memref<128x32xf32, #tpu.memory_space<vmem>>, vector<128x32xf32>
      tpu.vector_store %arg9[%c0_9, %c0_10], %16 {strides = array<i32>} : memref<128x32xf32, #tpu.memory_space<vmem>>, vector<128x32xf32>,
    } else {
    }
    %c128_i32 = arith.constant 128 : i32
    %3 = arith.muli %arg1, %c128_i32 : i32
    %4 = tpu.assume_multiple %3, 128 : i32
    %5 = arith.index_cast %4 : i32 to index
    %c0 = arith.constant 0 : index
    %6 = vector.load %arg2[%5, %c0] : memref<256x32xf32, #tpu.memory_space<vmem>>, vector<128x32xf32>
    %7 = arith.truncf %6 : vector<128x32xf32> to vector<128x32xbf16>
    %c0_1 = arith.constant 0 : index
    %c0_2 = arith.constant 0 : index
    %8 = vector.load %arg9[%c0_1, %c0_2] : memref<128x32xf32, #tpu.memory_space<vmem>>, vector<128x32xf32>
    %c0_3 = arith.constant 0 : index
    %c0_4 = arith.constant 0 : index
    %9 = vector.load %arg3[%c0_3, %c0_4] : memref<128x128xbf16, #tpu.memory_space<vmem>>, vector<128x128xbf16>
    %cst = arith.constant dense<0.000000e+00> : vector<128x32xf32>
    %10 = tpu.matmul %9, %7, %cst {dimension_numbers = #tpu.dot_dimension_numbers<[1], [0], [0], [1], [0, 0, 1, 1], [], []>} : vector<128x128xbf16>, vector<128x32xbf16>, vector<128x32xf32> -> vector<128x32xf32>
    %11 = arith.addf %8, %10 : vector<128x32xf32>
    %c0_5 = arith.constant 0 : index
    %c0_6 = arith.constant 0 : index
    %12 = vector.load %arg9[%c0_5, %c0_6] : memref<128x32xf32, #tpu.memory_space<vmem>>, vector<128x32xf32>
    tpu.vector_store %arg9[%c0_5, %c0_6], %11 {strides = array<i32>} : memref<128x32xf32, #tpu.memory_space<vmem>>, vector<128x32xf32>,
    %c1_i32 = arith.constant 1 : i32
    %13 = arith.cmpi eq, %arg1, %c1_i32 : i32
    %14 = arith.extui %13 : i1 to i32
    %c0_i32_7 = arith.constant 0 : i32
    %15 = arith.cmpi ne, %14, %c0_i32_7 : i32
    scf.if %15 {
      %c128_i32_8 = arith.constant 128 : i32
      %16 = arith.muli %arg0, %c128_i32_8 : i32
      %17 = tpu.assume_multiple %16, 128 : i32
      %18 = arith.index_cast %17 : i32 to index
      %c0_9 = arith.constant 0 : index
      %19 = vector.load %arg2[%18, %c0_9] : memref<256x32xf32, #tpu.memory_space<vmem>>, vector<128x32xf32>
      %c0_10 = arith.constant 0 : index
      %c0_11 = arith.constant 0 : index
      %20 = vector.load %arg4[%c0_10, %c0_11] : memref<32x16xf32, #tpu.memory_space<vmem>>, vector<32x16xf32>
      %cst_12 = arith.constant dense<0.000000e+00> : vector<128x16xf32>
      %21 = tpu.matmul %19, %20, %cst_12 {dimension_numbers = #tpu.dot_dimension_numbers<[1], [0], [0], [1], [0, 0, 1, 1], [], []>} : vector<128x32xf32>, vector<32x16xf32>, vector<128x16xf32> -> vector<128x16xf32>
      %c0_13 = arith.constant 0 : index
      %c0_14 = arith.constant 0 : index
      %22 = vector.load %arg5[%c0_13, %c0_14] : memref<1x16xf32, #tpu.memory_space<vmem>>, vector<1x16xf32>
      %23 = vector.broadcast %22 : vector<1x16xf32> to vector<128x16xf32>
      %24 = arith.addf %21, %23 : vector<128x16xf32>
      %c0_15 = arith.constant 0 : index
      %c0_16 = arith.constant 0 : index
      %25 = vector.load %arg6[%c0_15, %c0_16] : memref<1x16xf32, #tpu.memory_space<vmem>>, vector<1x16xf32>
      %26 = vector.broadcast %25 : vector<1x16xf32> to vector<128x16xf32>
      %27 = arith.mulf %24, %26 : vector<128x16xf32>
      %cst_17 = arith.constant dense<0.000000e+00> : vector<128xf32>
      %28 = vector.multi_reduction <add>, %27, %cst_17 [1] : vector<128x16xf32> to vector<128xf32>
      %29 = vector.shape_cast %28 : vector<128xf32> to vector<128x1xf32>
      %c0_18 = arith.constant 0 : index
      %c0_19 = arith.constant 0 : index
      %30 = memref.load %arg7[%c0_18, %c0_19] : memref<1x1xf32, #tpu.memory_space<smem>>
      %31 = vector.broadcast %30 : f32 to vector<128x1xf32>
      %32 = arith.addf %29, %31 : vector<128x1xf32>
      %33 = arith.negf %32 : vector<128x1xf32>
      %34 = math.exp %33 : vector<128x1xf32>
      %cst_20 = arith.constant 1.000000e+00 : f32
      %35 = vector.broadcast %cst_20 : f32 to vector<128x1xf32>
      %36 = arith.addf %35, %34 : vector<128x1xf32>
      %37 = arith.divf %35, %36 : vector<128x1xf32>
      %c0_21 = arith.constant 0 : index
      %c0_22 = arith.constant 0 : index
      %38 = vector.load %arg9[%c0_21, %c0_22] : memref<128x32xf32, #tpu.memory_space<vmem>>, vector<128x32xf32>
      %39 = vector.broadcast %37 : vector<128x1xf32> to vector<128x32xf32>
      %40 = arith.mulf %39, %38 : vector<128x32xf32>
      %41 = arith.subf %40, %19 : vector<128x32xf32>
      %c0_23 = arith.constant 0 : index
      %c0_24 = arith.constant 0 : index
      %42 = vector.load %arg8[%c0_23, %c0_24] : memref<128x32xf32, #tpu.memory_space<vmem>>, vector<128x32xf32>
      tpu.vector_store %arg8[%c0_23, %c0_24], %41 {strides = array<i32>} : memref<128x32xf32, #tpu.memory_space<vmem>>, vector<128x32xf32>,
    } else {
    }
    return
  }
  func.func @transform_0(%arg0: i32, %arg1: i32) -> (i32, i32) {
    %c0_i32 = arith.constant 0 : i32
    %c0_i32_0 = arith.constant 0 : i32
    %c0_i32_1 = arith.constant 0 : i32
    return %c0_i32, %c0_i32_0 : i32, i32
  }
  func.func @transform_1(%arg0: i32, %arg1: i32) -> (i32, i32) {
    %c0_i32 = arith.constant 0 : i32
    return %arg0, %arg1 : i32, i32
  }
  func.func @transform_2(%arg0: i32, %arg1: i32) -> (i32, i32) {
    %c0_i32 = arith.constant 0 : i32
    %c0_i32_0 = arith.constant 0 : i32
    %c0_i32_1 = arith.constant 0 : i32
    return %c0_i32, %c0_i32_0 : i32, i32
  }
  func.func @transform_3(%arg0: i32, %arg1: i32) -> (i32, i32) {
    %c0_i32 = arith.constant 0 : i32
    %c0_i32_0 = arith.constant 0 : i32
    %c0_i32_1 = arith.constant 0 : i32
    return %c0_i32, %c0_i32_0 : i32, i32
  }
  func.func @transform_4(%arg0: i32, %arg1: i32) -> (i32, i32) {
    %c0_i32 = arith.constant 0 : i32
    %c0_i32_0 = arith.constant 0 : i32
    %c0_i32_1 = arith.constant 0 : i32
    return %c0_i32, %c0_i32_0 : i32, i32
  }
  func.func @transform_5(%arg0: i32, %arg1: i32) -> (i32, i32) {
    %c0_i32 = arith.constant 0 : i32
    %c0_i32_0 = arith.constant 0 : i32
    %c0_i32_1 = arith.constant 0 : i32
    return %c0_i32, %c0_i32_0 : i32, i32
  }
  func.func @transform_6(%arg0: i32, %arg1: i32) -> (i32, i32) {
    %c0_i32 = arith.constant 0 : i32
    %c0_i32_0 = arith.constant 0 : i32
    return %arg0, %c0_i32 : i32, i32
  }
}

</mosaic_0001>

<bundles_post_ra>
// kernel: tpu_custom_call.1
= control target key start
LH: loop header
LB: loop body
LE: loop exit
PB: predicated region body
PF: predicated region fallthrough
CT: control target
= control target key end

     0   :  { %s2181_s0 = inlined_call_operand.vmem [shape: f32[256,32], index: 0, kind: input, shape index: {}]   ;;  %s2182_s1 = inlined_call_operand.vmem [shape: bf16[256,256], index: 1, kind: input, shape index: {}]   ;;  %s2183_s2 = inlined_call_operand.vmem [shape: f32[32,16], index: 2, kind: input, shape index: {}]   ;;  %s2184_s3 = inlined_call_operand.vmem [shape: f32[1,16], index: 3, kind: input, shape index: {}]   ;;  %s2185_s4 = inlined_call_operand.vmem [shape: f32[1,16], index: 4, kind: input, shape index: {}]   ;;  %s2186_s5 = inlined_call_operand.<no memory space> [shape: f32[1,1], index: 5, kind: input, shape index: {}]   ;;  %s2187_s6 = inlined_call_operand.vmem [shape: f32[256,32], index: 6, kind: output, shape index: {}]  }
   0x1   :  { %11 = sst [smem:[#allocation3]] %s2186_s5 }
   0x2   :  { %s1607_s23 = smov 0   ;;  %s1609_s24 = smov 0  }
   0x3   :  { %s1611_s25 = smov 0   ;;  %s1613_s26 = smov 0  }
   0x4   :  { %s1615_s27 = smov 0   ;;  %s1617_s28 = smov 0  }
   0x5   :  { %s1619_s29 = smov 0  }
   0x6 LB: > { %s26_s5 = sadd.s32 1, %s1558_s27  ;;  %s29_s30 = sadd.s32 1, %s1562_s28  ;;  %s1566_s29 = sphi %s1619_s29, %s17_s29   ;;  %s1562_s28 = sphi %s1617_s28, %s2213_s28   ;;  %s1558_s27 = sphi %s1615_s27, %s2212_s27   ;;  %s1554_s26 = sphi %s1613_s26, %s2211_s26   ;;  %s1550_s25 = sphi %s1611_s25, %s2210_s25   ;;  %s1546_s24 = sphi %s1609_s24, %s2209_s24   ;;  %s1542_s23 = sphi %s1607_s23, %s2208_s23  }
   0x7   : > { %p27_p0 = scmp.ge.s32.totalorder %s26_s5, 2  ;;  %p66_p1 = scmp.ne.s32.totalorder %s1546_s24, %s1542_s23 }
   0x8   : > { %p67_p2 = scmp.eq.s32.totalorder %s1566_s29, 0  ;;  %s59_s10 = sadd.s32 1, %s1546_s24 }
   0x9   : > { %s2215_s5 = smov (%p27_p0, %s26_s5), 0  ;;  %s2217_s30 = smov (!%p27_p0, %s29_s30), %s1562_s28 }
   0xa   : > { %p68_p3 = por %p67_p2, %p66_p1  ;;  %p31_p4 = scmp.ge.s32.totalorder %s2217_s30, 2 }
   0xb   : > { %s55_s7 = ssub.s32 %s1558_s27, %s2215_s5  ;;  %p1265_p6 = scmp.ge.s32.totalorder %s1566_s29, 4 }
   0xc   : > { %s2219_s30 = smov (%p31_p4, %s2217_s30), 0 }
   0xd   : > { %s54_s8 = ssub.s32 %s1562_s28, %s2219_s30  ;;  %217 = sbr.rel (%p1265_p6) target bundleno = 40 (0x28), region = 36 }
   0xe   : > { %s56_s9 = sor.u32 %s55_s7, %s54_s8 }
   0xf   : > { %p57_p5 = scmp.eq.s32.totalorder %s56_s9, 0 }
  0x11   : > { %s1658_s11 = scalar_select %p57_p5, %s1546_s24, %s59_s10  }
  0x12   : > { %220 = sbr.rel (!%p68_p3) target bundleno = 40 (0x28), region = 40  ;;  %s222_s12 = sand.u32 (%p68_p3), 1, %s1546_s24  }
  0x13   : > { %s1344_s13 = sshll.u32 (%p68_p3), %s1562_s28, 5  ;;  %s1266_s14 = sshll.u32 (%p68_p3), %s222_s12, 6 }
  0x14   : > { %s227_s15 = sadd.s32 (%p68_p3), %s1558_s27, %s1344_s13  ;;  %s224_s20 = scalar_lea.vmem (%p68_p3), [#allocation4], %s1266_s14 }
  0x15   : > { %s1269_s16 = sshll.u32 (%p68_p3), %s227_s15, 2 }
  0x16   : > { %s1667_s19 = scalar_lea.vmem (%p68_p3), %s2182_s1, %s1269_s16 }
  0x17   : > { %v246_v0 = vld [vmem:[%s1667_s19] sm:$0xf]  ;;  %v248_v1 = vld [vmem:[%s1667_s19 + $0x8] sm:$0xf]  ;;  %v250_v2 = vld [vmem:[%s1667_s19 + $0x10] sm:$0xf] }
  0x18   : > { %247 = vst [vmem:[%s224_s20] sm:$0xf] %v246_v0  ;;  %v252_v3 = vld [vmem:[%s1667_s19 + $0x18] sm:$0xf]  ;;  %v254_v4 = vld [vmem:[%s1667_s19 + $0x20] sm:$0xf] }
  0x19   : > { %249 = vst [vmem:[%s224_s20 + $0x4] sm:$0xf] %v248_v1  ;;  %v256_v5 = vld [vmem:[%s1667_s19 + $0x28] sm:$0xf]  ;;  %v258_v6 = vld [vmem:[%s1667_s19 + $0x30] sm:$0xf] }
  0x1a   : > { %251 = vst [vmem:[%s224_s20 + $0x8] sm:$0xf] %v250_v2  ;;  %v260_v7 = vld [vmem:[%s1667_s19 + $0x38] sm:$0xf]  ;;  %v262_v8 = vld [vmem:[%s1667_s19 + $0x40] sm:$0xf] }
  0x1b   : > { %253 = vst [vmem:[%s224_s20 + $0xc] sm:$0xf] %v252_v3  ;;  %v264_v9 = vld [vmem:[%s1667_s19 + $0x48] sm:$0xf]  ;;  %v266_v10 = vld [vmem:[%s1667_s19 + $0x50] sm:$0xf] }
  0x1c   : > { %255 = vst [vmem:[%s224_s20 + $0x10] sm:$0xf] %v254_v4  ;;  %v268_v11 = vld [vmem:[%s1667_s19 + $0x58] sm:$0xf]  ;;  %v270_v12 = vld [vmem:[%s1667_s19 + $0x60] sm:$0xf] }
  0x1d   : > { %257 = vst [vmem:[%s224_s20 + $0x14] sm:$0xf] %v256_v5  ;;  %v272_v13 = vld [vmem:[%s1667_s19 + $0x68] sm:$0xf]  ;;  %v274_v14 = vld [vmem:[%s1667_s19 + $0x70] sm:$0xf] }
  0x1e   : > { %259 = vst [vmem:[%s224_s20 + $0x18] sm:$0xf] %v258_v6  ;;  %v276_v15 = vld [vmem:[%s1667_s19 + $0x78] sm:$0xf] }
  0x1f   : > { %261 = vst [vmem:[%s224_s20 + $0x1c] sm:$0xf] %v260_v7 }
  0x20   : > { %263 = vst [vmem:[%s224_s20 + $0x20] sm:$0xf] %v262_v8 }
  0x21   : > { %265 = vst [vmem:[%s224_s20 + $0x24] sm:$0xf] %v264_v9 }
  0x22   : > { %267 = vst [vmem:[%s224_s20 + $0x28] sm:$0xf] %v266_v10 }
  0x23   : > { %269 = vst [vmem:[%s224_s20 + $0x2c] sm:$0xf] %v268_v11 }
  0x24   : > { %271 = vst [vmem:[%s224_s20 + $0x30] sm:$0xf] %v270_v12 }
  0x25   : > { %273 = vst [vmem:[%s224_s20 + $0x34] sm:$0xf] %v272_v13 }
  0x26   : > { %275 = vst [vmem:[%s224_s20 + $0x38] sm:$0xf] %v274_v14 }
  0x27   : > { %277 = vst [vmem:[%s224_s20 + $0x3c] sm:$0xf] %v276_v15 }
  0x28 PF: > { %p1270_p7 = scmp.ge.s32.totalorder %s1566_s29, 1  ;;  %p332_p8 = scmp.lt.s32.totalorder %s1566_s29, 5 }
  0x2a   : > { %p333_p9 = pnand %p1270_p7, %p332_p8 }
  0x2b   : > { %s339_s21 = sand.u32 (!%p333_p9), 1, %s1542_s23   ;;  %s1272_s22 = sshll.u32 (!%p333_p9), %s1554_s26, 4 }
  0x2c   : > { %336 = sbr.rel (%p333_p9) target bundleno = 626 (0x272), region = 81  ;;  %s1271_s7 = sshll.u32 (!%p333_p9), %s339_s21, 6 }
  0x2d   : > { %p370_p10 = scmp.lt.s32.totalorder (!%p333_p9), %s1272_s22, 31  ;;  %s1694_s13 = scalar_lea.vmem (!%p333_p9), [#allocation4], %s1271_s7 }
  0x2e   : > { %p1274_p11 = scmp.ne.s32.totalorder (!%p333_p9), %s1550_s25, 0 }
  0x31   : > { %s2221_s22 = smov (!%p370_p10, %s1272_s22), 31  ;;  %378 = sbr.rel (%p1274_p11) target bundleno = 71 (0x47), region = 89 }
  0x32   : > { %s1273_s8 = sshll.u32 %s2221_s22, 3 }
  0x33   : > { %s1692_s12 = scalar_lea.vmem %s2187_s6, %s1273_s8 }
  0x36   : > { %vm379_vm0 = vcmask 261120   ;;  %v1568_v16 = vmov 0.0  }
  0x37   : > { %380 = vst.msk [vmem:[#allocation2] sm:$0xff] %vm379_vm0, %v1568_v16 }
  0x38   : > { %381 = vst.msk [vmem:[#allocation2 + $0x8] sm:$0xff] %vm379_vm0, %v1568_v16 }
  0x39   : > { %382 = vst.msk [vmem:[#allocation2 + $0x10] sm:$0xff] %vm379_vm0, %v1568_v16 }
  0x3a   : > { %383 = vst.msk [vmem:[#allocation2 + $0x18] sm:$0xff] %vm379_vm0, %v1568_v16 }
  0x3b   : > { %384 = vst.msk [vmem:[#allocation2 + $0x20] sm:$0xff] %vm379_vm0, %v1568_v16 }
  0x3c   : > { %385 = vst.msk [vmem:[#allocation2 + $0x28] sm:$0xff] %vm379_vm0, %v1568_v16 }
  0x3d   : > { %386 = vst.msk [vmem:[#allocation2 + $0x30] sm:$0xff] %vm379_vm0, %v1568_v16 }
  0x3e   : > { %387 = vst.msk [vmem:[#allocation2 + $0x38] sm:$0xff] %vm379_vm0, %v1568_v16 }
  0x3f   : > { %388 = vst.msk [vmem:[#allocation2 + $0x40] sm:$0xff] %vm379_vm0, %v1568_v16 }
  0x40   : > { %389 = vst.msk [vmem:[#allocation2 + $0x48] sm:$0xff] %vm379_vm0, %v1568_v16 }
  0x41   : > { %390 = vst.msk [vmem:[#allocation2 + $0x50] sm:$0xff] %vm379_vm0, %v1568_v16 }
  0x42   : > { %391 = vst.msk [vmem:[#allocation2 + $0x58] sm:$0xff] %vm379_vm0, %v1568_v16 }
  0x43   : > { %392 = vst.msk [vmem:[#allocation2 + $0x60] sm:$0xff] %vm379_vm0, %v1568_v16 }
  0x44   : > { %393 = vst.msk [vmem:[#allocation2 + $0x68] sm:$0xff] %vm379_vm0, %v1568_v16 }
  0x45   : > { %394 = vst.msk [vmem:[#allocation2 + $0x70] sm:$0xff] %vm379_vm0, %v1568_v16 }
  0x46   : > { %395 = vst.msk [vmem:[#allocation2 + $0x78] sm:$0xff] %vm379_vm0, %v1568_v16 }
  0x47 PF: > { %s1275_s23 = sshll.u32 %s1550_s25, 7  ;;  %v1345_v41 = vld [vmem:[%s1694_s13] sm:$0xff]  ;;  %v1347_v42 = vld [vmem:[%s1694_s13 + $0x10] sm:$0xff]  ;;  %v1346_v45 = vld [vmem:[%s1694_s13 + $0x8] sm:$0xff]  ;;  %vm567_vm1 = vcmask 261120   ;;  %p1308_p12 = scmp.ne.s32.totalorder %s1550_s25, 1 }
  0x48   : > { %s1717_s16 = scalar_lea.vmem %s2181_s0, %s1275_s23  ;;  %v1349_v43 = vld [vmem:[%s1694_s13 + $0x20] sm:$0xff]  ;;  %v1351_v44 = vld [vmem:[%s1694_s13 + $0x30] sm:$0xff]  ;;  %v1348_v46 = vld [vmem:[%s1694_s13 + $0x18] sm:$0xff]  ;;  %s1309_s21 = sshll.u32 (!%p1308_p12), %s1554_s26, 7 }
  0x49   : > { %v412_v17 = vld [vmem:[%s1717_s16 + $0x70] sm:$0xff]  ;;  %v413_v18 = vld [vmem:[%s1717_s16 + $0x78] sm:$0xff]  ;;  %v410_v19 = vld [vmem:[%s1717_s16 + $0x60] sm:$0xff]  ;;  %s1773_s9 = scalar_lea.vmem (!%p1308_p12), %s2181_s0, %s1309_s21 }
  0x4a   : > { %v421_v20 = vpack.c.bf16 %v413_v18, %v412_v17  ;;  %v411_v21 = vld [vmem:[%s1717_s16 + $0x68] sm:$0xff]  ;;  %v408_v23 = vld [vmem:[%s1717_s16 + $0x50] sm:$0xff]  ;;  %v409_v24 = vld [vmem:[%s1717_s16 + $0x58] sm:$0xff] }
  0x4b   : > { %v420_v22 = vpack.c.bf16 %v411_v21, %v410_v19  ;;  %v419_v25 = vpack.c.bf16 %v409_v24, %v408_v23  ;;  %v406_v26 = vld [vmem:[%s1717_s16 + $0x40] sm:$0xff]  ;;  %v407_v27 = vld [vmem:[%s1717_s16 + $0x48] sm:$0xff]  ;;  %v404_v29 = vld [vmem:[%s1717_s16 + $0x30] sm:$0xff] }
  0x4c   : > { %502 = vmatpush.bf16.msra.mxu0 %v421_v20  ;;  %1353 = vmatpush.bf16.msra.mxu1 %v421_v20  ;;  %v418_v28 = vpack.c.bf16 %v407_v27, %v406_v26  ;;  %v405_v30 = vld [vmem:[%s1717_s16 + $0x38] sm:$0xff]  ;;  %v402_v32 = vld [vmem:[%s1717_s16 + $0x20] sm:$0xff]  ;;  %v403_v33 = vld [vmem:[%s1717_s16 + $0x28] sm:$0xff] }
  0x4d   : > { %1354 = vmatpush.bf16.msra.mxu2 %v421_v20  ;;  %1355 = vmatpush.bf16.msra.mxu3 %v421_v20  ;;  %v417_v31 = vpack.c.bf16 %v405_v30, %v404_v29  ;;  %v416_v34 = vpack.c.bf16 %v403_v33, %v402_v32  ;;  %v400_v35 = vld [vmem:[%s1717_s16 + $0x10] sm:$0xff]  ;;  %v401_v36 = vld [vmem:[%s1717_s16 + $0x18] sm:$0xff]  ;;  %v398_v38 = vld [vmem:[%s1717_s16] sm:$0xff] }
  0x4e   : > { %v415_v37 = vpack.c.bf16 %v401_v36, %v400_v35  ;;  %v399_v39 = vld [vmem:[%s1717_s16 + $0x8] sm:$0xff]  ;;  %v1352_v48 = vld [vmem:[%s1694_s13 + $0x38] sm:$0xff]  ;;  %v422_v49 = vld [vmem:[#allocation2] sm:$0xff]  ;;  %s796_s16 = sld [smem:[#allocation3]] (!%p1308_p12) }
  0x4f   : > { %v414_v40 = vpack.c.bf16 %v399_v39, %v398_v38  ;;  %v1350_v47 = vld [vmem:[%s1694_s13 + $0x28] sm:$0xff]  ;;  %v426_v50 = vld [vmem:[#allocation2 + $0x20] sm:$0xff]  ;;  %v424_v5 = vld [vmem:[#allocation2 + $0x10] sm:$0xff] }
  0x50   : > { %503 = vmatpush.bf16.msra.mxu0 %v420_v22  ;;  %1356 = vmatpush.bf16.msra.mxu1 %v420_v22  ;;  %v430_v55 = vld [vmem:[#allocation2 + $0x40] sm:$0xff]  ;;  %v423_v57 = vld [vmem:[#allocation2 + $0x8] sm:$0xff]  ;;  %v428_v6 = vld [vmem:[#allocation2 + $0x30] sm:$0xff] }
  0x51   : > { %1357 = vmatpush.bf16.msra.mxu2 %v420_v22  ;;  %1358 = vmatpush.bf16.msra.mxu3 %v420_v22  ;;  %v434_v56 = vld [vmem:[#allocation2 + $0x60] sm:$0xff]  ;;  %v427_v58 = vld [vmem:[#allocation2 + $0x28] sm:$0xff]  ;;  %v432_v15 = vld [vmem:[#allocation2 + $0x50] sm:$0xff] }
  0x52   : > { %v431_v3 = vld [vmem:[#allocation2 + $0x48] sm:$0xff]  ;;  %v436_v16 = vld [vmem:[#allocation2 + $0x70] sm:$0xff]  ;;  %v425_v17 = vld [vmem:[#allocation2 + $0x18] sm:$0xff] }
  0x53   : > { %v435_v4 = vld [vmem:[#allocation2 + $0x68] sm:$0xff]  ;;  %v429_v18 = vld [vmem:[#allocation2 + $0x38] sm:$0xff] }
  0x54   : > { %504 = vmatpush.bf16.msra.mxu0 %v419_v25  ;;  %1359 = vmatpush.bf16.msra.mxu1 %v419_v25  ;;  %v433_v27 = vld [vmem:[#allocation2 + $0x58] sm:$0xff] }
  0x55   : > { %1360 = vmatpush.bf16.msra.mxu2 %v419_v25  ;;  %1361 = vmatpush.bf16.msra.mxu3 %v419_v25 }
  0x58   : > { %505 = vmatpush.bf16.msra.mxu0 %v418_v28  ;;  %1362 = vmatpush.bf16.msra.mxu1 %v418_v28 }
  0x59   : > { %1363 = vmatpush.bf16.msra.mxu2 %v418_v28  ;;  %1364 = vmatpush.bf16.msra.mxu3 %v418_v28  ;;  %v437_v28 = vld [vmem:[#allocation2 + $0x78] sm:$0xff] }
  0x5c   : > { %506 = vmatpush.bf16.msra.mxu0 %v417_v31  ;;  %1365 = vmatpush.bf16.msra.mxu1 %v417_v31 }
  0x5d   : > { %1366 = vmatpush.bf16.msra.mxu2 %v417_v31  ;;  %1367 = vmatpush.bf16.msra.mxu3 %v417_v31 }
  0x60   : > { %507 = vmatpush.bf16.msra.mxu0 %v416_v34  ;;  %1368 = vmatpush.bf16.msra.mxu1 %v416_v34 }
  0x61   : > { %1369 = vmatpush.bf16.msra.mxu2 %v416_v34  ;;  %1370 = vmatpush.bf16.msra.mxu3 %v416_v34 }
  0x64   : > { %508 = vmatpush.bf16.msra.mxu0 %v415_v37  ;;  %1371 = vmatpush.bf16.msra.mxu1 %v415_v37 }
  0x65   : > { %1372 = vmatpush.bf16.msra.mxu2 %v415_v37  ;;  %1373 = vmatpush.bf16.msra.mxu3 %v415_v37 }
  0x68   : > { %509 = vmatpush.bf16.msra.mxu0 %v414_v40  ;;  %1374 = vmatpush.bf16.msra.mxu1 %v414_v40 }
  0x69   : > { %1375 = vmatpush.bf16.msra.mxu2 %v414_v40  ;;  %1376 = vmatpush.bf16.msra.mxu3 %v414_v40 }
  0x6b   : > { %510 = vmatmul.bf16.vlgmr.msra.gmra.mxu0 %v1345_v41  ;;  %520 = vmatmul.bf16.vlgmr.msra.gmra.mxu1 %v1347_v42 }
  0x6c   : > { %530 = vmatmul.bf16.vlgmr.msra.gmra.mxu2 %v1349_v43  ;;  %540 = vmatmul.bf16.vlgmr.msra.gmra.mxu3 %v1351_v44 }
  0x7b   : > { %515 = vmatmul.bf16.gmra.mxu0 %v1346_v45  ;;  %525 = vmatmul.bf16.gmra.mxu1 %v1348_v46 }
  0x7c   : > { %535 = vmatmul.bf16.gmra.mxu2 %v1350_v47  ;;  %545 = vmatmul.bf16.gmra.mxu3 %v1352_v48 }
  0xe8   : > { %v511_v51 = vpop.f32.mrf.mxu0  ;;  %v521_v52 = vpop.f32.mrf.mxu1 }
  0xe9   : > { %v551_v53 = vadd.f32 %v511_v51, %v422_v49  ;;  %v555_v54 = vadd.f32 %v521_v52, %v426_v50 }
  0xeb   : > { %568 = vst.msk [vmem:[#allocation2] sm:$0xff] %vm567_vm1, %v551_v53 }
  0xec   : > { %572 = vst.msk [vmem:[#allocation2 + $0x20] sm:$0xff] %vm567_vm1, %v555_v54 }
  0xef   : > { %v531_v59 = vpop.f32.mrf.mxu2  ;;  %v541_v60 = vpop.f32.mrf.mxu3 }
  0xf0   : > { %v559_v61 = vadd.f32 %v531_v59, %v430_v55  ;;  %v563_v62 = vadd.f32 %v541_v60, %v434_v56  ;;  %v513_v63 = vpop.f32.mrf.mxu0  ;;  %v523_v0 = vpop.f32.mrf.mxu1 }
  0xf1   : > { %v552_v1 = vadd.f32 %v513_v63, %v423_v57  ;;  %v556_v2 = vadd.f32 %v523_v0, %v427_v58 }
  0xf2   : > { %576 = vst.msk [vmem:[#allocation2 + $0x40] sm:$0xff] %vm567_vm1, %v559_v61 }
  0xf3   : > { %580 = vst.msk [vmem:[#allocation2 + $0x60] sm:$0xff] %vm567_vm1, %v563_v62 }
  0xf4   : > { %569 = vst.msk [vmem:[#allocation2 + $0x8] sm:$0xff] %vm567_vm1, %v552_v1 }
  0xf5   : > { %573 = vst.msk [vmem:[#allocation2 + $0x28] sm:$0xff] %vm567_vm1, %v556_v2 }
  0xf7   : > { %v533_v7 = vpop.f32.mrf.mxu2  ;;  %v543_v8 = vpop.f32.mrf.mxu3 }
  0xf8   : > { %v560_v9 = vadd.f32 %v533_v7, %v431_v3  ;;  %v564_v10 = vadd.f32 %v543_v8, %v435_v4  ;;  %v516_v11 = vpop.f32.mrf.mxu0  ;;  %v526_v12 = vpop.f32.mrf.mxu1 }
  0xf9   : > { %v553_v13 = vadd.f32 %v516_v11, %v424_v5  ;;  %v557_v14 = vadd.f32 %v526_v12, %v428_v6 }
  0xfa   : > { %577 = vst.msk [vmem:[#allocation2 + $0x48] sm:$0xff] %vm567_vm1, %v560_v9 }
  0xfb   : > { %581 = vst.msk [vmem:[#allocation2 + $0x68] sm:$0xff] %vm567_vm1, %v564_v10 }
  0xfc   : > { %570 = vst.msk [vmem:[#allocation2 + $0x10] sm:$0xff] %vm567_vm1, %v553_v13 }
  0xfd   : > { %574 = vst.msk [vmem:[#allocation2 + $0x30] sm:$0xff] %vm567_vm1, %v557_v14 }
  0xff   : > { %v536_v19 = vpop.f32.mrf.mxu2  ;;  %v546_v20 = vpop.f32.mrf.mxu3 }
 0x100   : > { %v561_v21 = vadd.f32 %v536_v19, %v432_v15  ;;  %v565_v22 = vadd.f32 %v546_v20, %v436_v16  ;;  %v518_v23 = vpop.f32.mrf.mxu0  ;;  %v528_v24 = vpop.f32.mrf.mxu1 }
 0x101   : > { %v554_v25 = vadd.f32 %v518_v23, %v425_v17  ;;  %v558_v26 = vadd.f32 %v528_v24, %v429_v18 }
 0x102   : > { %578 = vst.msk [vmem:[#allocation2 + $0x50] sm:$0xff] %vm567_vm1, %v561_v21 }
 0x103   : > { %582 = vst.msk [vmem:[#allocation2 + $0x70] sm:$0xff] %vm567_vm1, %v565_v22 }
 0x104   : > { %571 = vst.msk [vmem:[#allocation2 + $0x18] sm:$0xff] %vm567_vm1, %v554_v25 }
 0x105   : > { %575 = vst.msk [vmem:[#allocation2 + $0x38] sm:$0xff] %vm567_vm1, %v558_v26 }
 0x107   : > { %v538_v29 = vpop.f32.mrf.mxu2  ;;  %v548_v30 = vpop.f32.mrf.mxu3  ;;  %587 = sbr.rel (%p1308_p12) target bundleno = 626 (0x272), region = 93 }
 0x108   : > { %v562_v31 = vadd.f32 %v538_v29, %v433_v27  ;;  %v566_v32 = vadd.f32 %v548_v30, %v437_v28 }
 0x10a   : > { %579 = vst.msk [vmem:[#allocation2 + $0x58] sm:$0xff] %vm567_vm1, %v562_v31 }
 0x10b   : > { %583 = vst.msk [vmem:[#allocation2 + $0x78] sm:$0xff] %vm567_vm1, %v566_v32 }
 0x10c   : > { %v609_v33 = vld [vmem:[%s2183_s2 + $0x18] sm:$0xff]  ;;  %v608_v34 = vld [vmem:[%s2183_s2 + $0x10] sm:$0xff]  ;;  %v607_v35 = vld [vmem:[%s2183_s2 + $0x8] sm:$0xff]  ;;  %vm747_vm2 = vcmask 130048  }
 0x10d   : > { %674 = vmatpush.msra.mxu0 %v609_v33  ;;  %1377 = vmatpush.msra.mxu1 %v609_v33  ;;  %v606_v36 = vld [vmem:[%s2183_s2] sm:$0xff]  ;;  %v1799_v41 = vld [vmem:[%s1773_s9 + $0x8] sm:$0xff]  ;;  %v1819_v45 = vld [vmem:[%s1773_s9 + $0x10] sm:$0xff] }
 0x10e   : > { %1378 = vmatpush.msra.mxu2 %v609_v33  ;;  %1379 = vmatpush.msra.mxu3 %v609_v33  ;;  %v1779_v37 = vld [vmem:[%s1773_s9] sm:$0xff]  ;;  %v1802_v42 = vld [vmem:[%s1773_s9 + $0x48] sm:$0xff]  ;;  %v1822_v46 = vld [vmem:[%s1773_s9 + $0x50] sm:$0xff] }
 0x10f   : > { %675 = vmatpush.msra.mxu0 %v608_v34  ;;  %1380 = vmatpush.msra.mxu1 %v608_v34  ;;  %v1782_v38 = vld [vmem:[%s1773_s9 + $0x20] sm:$0xff]  ;;  %v1805_v43 = vld [vmem:[%s1773_s9 + $0x28] sm:$0xff]  ;;  %v1825_v47 = vld [vmem:[%s1773_s9 + $0x30] sm:$0xff] }
 0x110   : > { %1381 = vmatpush.msra.mxu2 %v608_v34  ;;  %1382 = vmatpush.msra.mxu3 %v608_v34  ;;  %v1785_v39 = vld [vmem:[%s1773_s9 + $0x40] sm:$0xff]  ;;  %v1810_v44 = vld [vmem:[%s1773_s9 + $0x68] sm:$0xff]  ;;  %v1830_v48 = vld [vmem:[%s1773_s9 + $0x70] sm:$0xff] }
 0x111   : > { %676 = vmatpush.msra.mxu0 %v607_v35  ;;  %1383 = vmatpush.msra.mxu1 %v607_v35  ;;  %v1790_v40 = vld [vmem:[%s1773_s9 + $0x60] sm:$0xff]  ;;  %v1839_v49 = vld [vmem:[%s1773_s9 + $0x18] sm:$0xff] }
 0x112   : > { %1384 = vmatpush.msra.mxu2 %v607_v35  ;;  %1385 = vmatpush.msra.mxu3 %v607_v35  ;;  %v1842_v50 = vld [vmem:[%s1773_s9 + $0x58] sm:$0xff]  ;;  %v1861_v53 = vld [vmem:[%s2184_s3] ss:$0 sm:$0xff] }
 0x113   : > { %677 = vmatpush.msra.mxu0 %v606_v36  ;;  %1386 = vmatpush.msra.mxu1 %v606_v36  ;;  %v1845_v51 = vld [vmem:[%s1773_s9 + $0x38] sm:$0xff]  ;;  %v1866_v54 = vld [vmem:[%s2185_s4] ss:$0 sm:$0xff] }
 0x114   : > { %1387 = vmatpush.msra.mxu2 %v606_v36  ;;  %1310 = vmatmul.msk.f32.vlgmr.msra.gmra.mxu0 %vm567_vm1, %v1779_v37  ;;  %v1850_v52 = vld [vmem:[%s1773_s9 + $0x78] sm:$0xff] }
 0x115   : > { %1314 = vmatmul.msk.f32.vlgmr.msra.gmra.mxu1 %vm567_vm1, %v1782_v38  ;;  %1318 = vmatmul.msk.f32.vlgmr.msra.gmra.mxu2 %vm567_vm1, %v1785_v39 }
 0x116   : > { %1388 = vmatpush.msra.mxu3 %v606_v36 }
 0x117   : > { %1322 = vmatmul.msk.f32.vlgmr.msra.gmra.mxu3 %vm567_vm1, %v1790_v40 }
 0x11c   : > { %1311 = vmatmul.msk.f32.gmra.mxu0 %vm567_vm1, %v1799_v41 }
 0x11d   : > { %1319 = vmatmul.msk.f32.gmra.mxu2 %vm567_vm1, %v1802_v42  ;;  %1315 = vmatmul.msk.f32.gmra.mxu1 %vm567_vm1, %v1805_v43 }
 0x11f   : > { %1323 = vmatmul.msk.f32.gmra.mxu3 %vm567_vm1, %v1810_v44 }
 0x124   : > { %1312 = vmatmul.msk.f32.gmra.mxu0 %vm567_vm1, %v1819_v45 }
 0x125   : > { %1320 = vmatmul.msk.f32.gmra.mxu2 %vm567_vm1, %v1822_v46  ;;  %1316 = vmatmul.msk.f32.gmra.mxu1 %vm567_vm1, %v1825_v47 }
 0x127   : > { %1324 = vmatmul.msk.f32.gmra.mxu3 %vm567_vm1, %v1830_v48 }
 0x12c   : > { %1313 = vmatmul.msk.f32.gmra.mxu0 %vm567_vm1, %v1839_v49 }
 0x12d   : > { %1321 = vmatmul.msk.f32.gmra.mxu2 %vm567_vm1, %v1842_v50  ;;  %1317 = vmatmul.msk.f32.gmra.mxu1 %vm567_vm1, %v1845_v51 }
 0x12f   : > { %1325 = vmatmul.msk.f32.gmra.mxu3 %vm567_vm1, %v1850_v52 }
 0x191   : > { %v679_v55 = vpop.f32.mrf.mxu0 }
 0x192   : > { %v680_v56 = vadd.f32 %v1861_v53, %v679_v55  ;;  %v691_v57 = vpop.f32.mrf.mxu1 }
 0x193   : > { %v692_v58 = vadd.f32 %v1861_v53, %v691_v57 }
 0x194   : > { %v731_v59 = vmul.f32 %v1866_v54, %v680_v56 }
 0x195   : > { %v735_v60 = vmul.f32 %v1866_v54, %v692_v58 }
 0x196   : > { %v748_v61 = vsel %vm747_vm2, %v731_v59, 0.0 }
 0x197   : > { %v760_v62 = vsel %vm747_vm2, %v735_v60, 0.0  ;;  %749 = vadd.xlane.f32.xlu0 %v748_v61 }
 0x198   : > { %v703_v63 = vpop.f32.mrf.mxu2  ;;  %761 = vadd.xlane.f32.xlu2 %v760_v62 }
 0x199   : > { %v704_v0 = vadd.f32 %v1861_v53, %v703_v63  ;;  %v682_v1 = vpop.f32.mrf.mxu0 }
 0x19a   : > { %v715_v2 = vpop.f32.mrf.mxu3  ;;  %v694_v3 = vpop.f32.mrf.mxu1  ;;  %v683_v9 = vadd.f32 %v1861_v53, %v682_v1 }
 0x19b   : > { %v716_v4 = vadd.f32 %v1861_v53, %v715_v2  ;;  %v739_v5 = vmul.f32 %v1866_v54, %v704_v0  ;;  %v695_v8 = vadd.f32 %v1861_v53, %v694_v3 }
 0x19c   : > { %v732_v16 = vmul.f32 %v1866_v54, %v683_v9  ;;  %v1916_v9 = vstv %s796_s16 }
 0x19d   : > { %v772_v6 = vsel %vm747_vm2, %v739_v5, 0.0  ;;  %v743_v7 = vmul.f32 %v1866_v54, %v716_v4  ;;  %v736_v13 = vmul.f32 %v1866_v54, %v695_v8 }
 0x19e   : > { %v751_v21 = vsel %vm747_vm2, %v732_v16, 0.0 }
 0x19f   : > { %v784_v10 = vsel %vm747_vm2, %v743_v7, 0.0  ;;  %v763_v18 = vsel %vm747_vm2, %v736_v13, 0.0 }
 0x1a0   : > { %v706_v11 = vpop.f32.mrf.mxu2  ;;  %773 = vadd.xlane.f32.xlu2 %v772_v6  ;;  %785 = vadd.xlane.f32.xlu0 %v784_v10 }
 0x1a1   : > { %v685_v12 = vpop.f32.mrf.mxu0  ;;  %v707_v20 = vadd.f32 %v1861_v53, %v706_v11 }
 0x1a2   : > { %v686_v14 = vadd.f32 %v1861_v53, %v685_v12  ;;  %v718_v15 = vpop.f32.mrf.mxu3  ;;  %v697_v22 = vpop.f32.mrf.mxu1 }
 0x1a3   : > { %v740_v28 = vmul.f32 %v1866_v54, %v707_v20  ;;  %v698_v31 = vadd.f32 %v1861_v53, %v697_v22  ;;  %v719_v6 = vadd.f32 %v1861_v53, %v718_v15 }
 0x1a4   : > { %v733_v17 = vmul.f32 %v1866_v54, %v686_v14 }
 0x1a5   : > { %v775_v32 = vsel %vm747_vm2, %v740_v28, 0.0  ;;  %v737_v36 = vmul.f32 %v1866_v54, %v698_v31  ;;  %v744_v7 = vmul.f32 %v1866_v54, %v719_v6 }
 0x1a6   : > { %v754_v19 = vsel %vm747_vm2, %v733_v17, 0.0 }
 0x1a7   : > { %755 = vadd.xlane.f32.xlu1 %v754_v19  ;;  %v766_v62 = vsel %vm747_vm2, %v737_v36, 0.0  ;;  %v787_v8 = vsel %vm747_vm2, %v744_v7, 0.0 }
 0x1a8   : > { %v709_v23 = vpop.f32.mrf.mxu2  ;;  %764 = vadd.xlane.f32.xlu2 %v763_v18  ;;  %752 = vadd.xlane.f32.xlu0 %v751_v21 }
 0x1a9   : > { %v710_v24 = vadd.f32 %v1861_v53, %v709_v23  ;;  %v688_v25 = vpop.f32.mrf.mxu0 }
 0x1aa   : > { %v721_v26 = vpop.f32.mrf.mxu3  ;;  %v689_v29 = vadd.f32 %v1861_v53, %v688_v25  ;;  %v700_v55 = vpop.f32.mrf.mxu1 }
 0x1ab   : > { %v741_v27 = vmul.f32 %v1866_v54, %v710_v24  ;;  %v722_v57 = vadd.f32 %v1861_v53, %v721_v26  ;;  %v701_v60 = vadd.f32 %v1861_v53, %v700_v55 }
 0x1ac   : > { %v734_v34 = vmul.f32 %v1866_v54, %v689_v29 }
 0x1ad   : > { %v778_v30 = vsel %vm747_vm2, %v741_v27, 0.0  ;;  %v745_v0 = vmul.f32 %v1866_v54, %v722_v57  ;;  %v738_v1 = vmul.f32 %v1866_v54, %v701_v60 }
 0x1ae   : > { %v757_v59 = vsel %vm747_vm2, %v734_v34, 0.0 }
 0x1af   : > { %779 = vadd.xlane.f32.xlu1 %v778_v30  ;;  %v790_v3 = vsel %vm747_vm2, %v745_v0, 0.0  ;;  %v769_v4 = vsel %vm747_vm2, %v738_v1, 0.0 }
 0x1b0   : > { %v712_v33 = vpop.f32.mrf.mxu2  ;;  %776 = vadd.xlane.f32.xlu0 %v775_v32 }
 0x1b1   : > { %v713_v35 = vadd.f32 %v1861_v53, %v712_v33 }
 0x1b2   : > { %v724_v56 = vpop.f32.mrf.mxu3 }
 0x1b3   : > { %v742_v58 = vmul.f32 %v1866_v54, %v713_v35  ;;  %v725_v63 = vadd.f32 %v1861_v53, %v724_v56 }
 0x1b5   : > { %v781_v61 = vsel %vm747_vm2, %v742_v58, 0.0  ;;  %v746_v2 = vmul.f32 %v1866_v54, %v725_v63 }
 0x1b6   : > { %782 = vadd.xlane.f32.xlu2 %v781_v61 }
 0x1b7   : > { %758 = vadd.xlane.f32.xlu1 %v757_v59  ;;  %v793_v5 = vsel %vm747_vm2, %v746_v2, 0.0 }
 0x1b8   : > { %767 = vadd.xlane.f32.xlu0 %v766_v62 }
 0x1be   : > { %791 = vadd.xlane.f32.xlu2 %v790_v3 }
 0x1bf   : > { %770 = vadd.xlane.f32.xlu1 %v769_v4 }
 0x1c0   : > { %794 = vadd.xlane.f32.xlu0 %v793_v5 }
 0x1c7   : > { %788 = vadd.xlane.f32.xlu1 %v787_v8 }
 0x20a   : > { %v750_v10 = vpop.xlane.xlu0 %749 }
 0x20b   : > { %v762_v11 = vpop.xlane.xlu2 %761  ;;  %v798_v12 = vadd.f32 %v1916_v9, %v750_v10 }
 0x20c   : > { %v802_v13 = vadd.f32 %v1916_v9, %v762_v11 }
 0x20d   : > { %v1326_v14 = vmul.f32 -1.442695, %v798_v12 }
 0x20e   : > { %v1330_v16 = vmul.f32 -1.442695, %v802_v13 }
 0x20f   : > { %1448 = vpow2.f32 %v1326_v14  ;;  %v1118_v14 = vld [vmem:[#allocation2] sm:$0xff] }
 0x210   : > { %1450 = vpow2.f32 %v1330_v16 }
 0x213   : > { %v774_v53 = vpop.xlane.xlu2 %773  ;;  %v786_v15 = vpop.xlane.xlu0 %785 }
 0x214   : > { %v806_v54 = vadd.f32 %v1916_v9, %v774_v53  ;;  %v810_v17 = vadd.f32 %v1916_v9, %v786_v15 }
 0x215   : > { %v1449_v18 = vpop.eup %1448 }
 0x216   : > { %v1451_v19 = vpop.eup %1450  ;;  %v862_v20 = vadd.f32 1.0, %v1449_v18  ;;  %v1334_v21 = vmul.f32 -1.442695, %v806_v54  ;;  %v1338_v23 = vmul.f32 -1.442695, %v810_v17  ;;  %v1122_v54 = vld [vmem:[#allocation2 + $0x20] sm:$0xff] }
 0x217   : > { %v866_v22 = vadd.f32 1.0, %v1451_v19 }
 0x218   : > { %1452 = vrcp.f32 %v862_v20  ;;  %v887_v36 = vand.u32 2147483647, %v862_v20  ;;  %v889_v57 = vand.u32 2147483648, %v862_v20  ;;  %vm883_vm6 = vweird.f32 %v862_v20 }
 0x219   : > { %1454 = vrcp.f32 %v866_v22  ;;  %vm943_vm3 = vweird.f32 %v866_v22  ;;  %v947_v59 = vand.u32 2147483647, %v866_v22  ;;  %v949_v60 = vand.u32 2147483648, %v866_v22 }
 0x21a   : > { %1456 = vpow2.f32 %v1334_v21  ;;  %v756_v24 = vpop.xlane.xlu1 %755  ;;  %vm1930_vm7 = vcmp.eq.f32.partialorder %v887_v36, 8.507059e+37  ;;  %v890_v11 = vor.u32 1.1754944e-38, %v889_v57 }
 0x21b   : > { %1458 = vpow2.f32 %v1338_v23  ;;  %v765_v25 = vpop.xlane.xlu2 %764  ;;  %v800_v26 = vadd.f32 %v1916_v9, %v756_v24  ;;  %v753_v27 = vpop.xlane.xlu0 %752  ;;  %vm1940_vm9 = vcmp.eq.f32.partialorder %v947_v59, 8.507059e+37  ;;  %v950_v8 = vor.u32 1.1754944e-38, %v949_v60 }
 0x21c   : > { %v803_v28 = vadd.f32 %v1916_v9, %v765_v25  ;;  %v799_v29 = vadd.f32 %v1916_v9, %v753_v27 }
 0x21d   : > { %v1328_v30 = vmul.f32 -1.442695, %v800_v26 }
 0x21e   : > { %v1453_v31 = vpop.eup %1452  ;;  %v1331_v32 = vmul.f32 -1.442695, %v803_v28  ;;  %v1327_v33 = vmul.f32 -1.442695, %v799_v29 }
 0x21f   : > { %v1455_v34 = vpop.eup %1454  ;;  %v879_v35 = vmul.f32 %v1453_v31, %v862_v20  ;;  %1460 = vpow2.f32 %v1328_v30  ;;  %vm884_vm5 = vweird.f32 %v1453_v31 }
 0x220   : > { %v1457_v55 = vpop.eup %1456  ;;  %v939_v56 = vmul.f32 %v1455_v34, %v866_v22  ;;  %1462 = vpow2.f32 %v1331_v32  ;;  %vm944_vm4 = vweird.f32 %v1455_v34  ;;  %vm885_vm10 = vmor %vm883_vm6, %vm884_vm5 }
 0x221   : > { %v1459_v58 = vpop.eup %1458  ;;  %v880_v61 = vsub.f32 1.0, %v879_v35  ;;  %v1925_v62 = vadd.f32 1.0, %v1457_v55  ;;  %1464 = vpow2.f32 %v1327_v33  ;;  %vm1936_vm8 = vmor %vm943_vm3, %vm944_vm4 }
 0x222   : > { %v940_v63 = vsub.f32 1.0, %v939_v56  ;;  %v1927_v0 = vadd.f32 1.0, %v1459_v58  ;;  %v780_v1 = vpop.xlane.xlu1 %779 }
 0x223   : > { %v881_v2 = vmul.f32 %v1453_v31, %v880_v61  ;;  %1466 = vrcp.f32 %v1925_v62  ;;  %v1007_v16 = vand.u32 2147483647, %v1925_v62  ;;  %v1009_v53 = vand.u32 2147483648, %v1925_v62  ;;  %v777_v27 = vpop.xlane.xlu0 %776 }
 0x224   : > { %v941_v3 = vmul.f32 %v1455_v34, %v940_v63  ;;  %1468 = vrcp.f32 %v1927_v0  ;;  %v1067_v18 = vand.u32 2147483647, %v1927_v0  ;;  %v1069_v19 = vand.u32 2147483648, %v1927_v0 }
 0x225   : > { %v1461_v5 = vpop.eup %1460  ;;  %v882_v10 = vadd.f32 %v1453_v31, %v881_v2  ;;  %vm1003_vm11 = vweird.f32 %v1925_v62  ;;  %vm1063_vm12 = vweird.f32 %v1927_v0  ;;  %vm1964_vm13 = vcmp.eq.f32.partialorder %v1007_v16, 8.507059e+37 }
 0x226   : > { %v1463_v12 = vpop.eup %1462  ;;  %v942_v13 = vadd.f32 %v1455_v34, %v941_v3  ;;  %v1947_v15 = vadd.f32 1.0, %v1461_v5  ;;  %v1010_v32 = vor.u32 1.1754944e-38, %v1009_v53  ;;  %v808_v33 = vadd.f32 %v1916_v9, %v780_v1 }
 0x227   : > { %v886_v17 = vsel %vm885_vm10, %v1453_v31, %v882_v10  ;;  %v1951_v20 = vadd.f32 1.0, %v1463_v12  ;;  %v1465_v21 = vpop.eup %1464  ;;  %vm1971_vm14 = vcmp.eq.f32.partialorder %v1067_v18, 8.507059e+37  ;;  %v1070_v55 = vor.u32 1.1754944e-38, %v1069_v19  ;;  %v1130_v18 = vld [vmem:[#allocation2 + $0x60] sm:$0xff] }
 0x228   : > { %v946_v22 = vsel %vm1936_vm8, %v1455_v34, %v942_v13  ;;  %v891_v23 = vsel %vm1930_vm7, %v890_v11, %v886_v17  ;;  %1470 = vrcp.f32 %v1947_v15  ;;  %v917_v61 = vand.u32 2147483647, %v1947_v15 }
 0x229   : > { %v1467_v24 = vpop.eup %1466  ;;  %v951_v25 = vsel %vm1940_vm9, %v950_v8, %v946_v22  ;;  %v1134_v26 = vmul.f32 %v1118_v14, %v891_v23  ;;  %1472 = vrcp.f32 %v1951_v20  ;;  %v964_v56 = vand.u32 2147483648, %v1951_v20  ;;  %v783_v13 = vpop.xlane.xlu2 %782  ;;  %v1126_v14 = vld [vmem:[#allocation2 + $0x40] sm:$0xff] }
 0x22a   : > { %v1469_v28 = vpop.eup %1468  ;;  %v1138_v29 = vmul.f32 %v1122_v54, %v951_v25  ;;  %v999_v30 = vmul.f32 %v1467_v24, %v1925_v62  ;;  %v759_v57 = vpop.xlane.xlu1 %758  ;;  %v962_v60 = vand.u32 2147483647, %v1951_v20  ;;  %vm958_vm15 = vweird.f32 %v1951_v20 }
 0x22b   : > { %v1150_v34 = vsub.f32 %v1134_v26, %v1779_v37  ;;  %v1059_v35 = vmul.f32 %v1469_v28, %v1927_v0  ;;  %vm913_vm0 = vweird.f32 %v1947_v15  ;;  %v1983_v63 = vadd.f32 1.0, %v1465_v21  ;;  %v768_v25 = vpop.xlane.xlu0 %767 }
 0x22c   : > { %v1154_v58 = vsub.f32 %v1138_v29, %v1782_v38  ;;  %v1000_v59 = vsub.f32 1.0, %v999_v30  ;;  %vm1004_vm2 = vweird.f32 %v1467_v24  ;;  %v919_v38 = vand.u32 2147483648, %v1947_v15 }
 0x22d   : > { %1166 = vst.msk [vmem:[%s1692_s12] sm:$0xff] %vm567_vm1, %v1150_v34  ;;  %v1060_v37 = vsub.f32 1.0, %v1059_v35  ;;  %v1336_v3 = vmul.f32 -1.442695, %v808_v33  ;;  %vm1064_vm3 = vweird.f32 %v1469_v28  ;;  %v965_v6 = vor.u32 1.1754944e-38, %v964_v56  ;;  %vm1005_vm6 = vmor %vm1003_vm11, %vm1004_vm2  ;;  %v1120_v56 = vld [vmem:[#allocation2 + $0x10] sm:$0xff] }
 0x22e   : > { %v1471_v1 = vpop.eup %1470  ;;  %1170 = vst.msk [vmem:[%s1692_s12 + $0x20] sm:$0xff] %vm567_vm1, %v1154_v58  ;;  %v1001_v2 = vmul.f32 %v1467_v24, %v1000_v59  ;;  %vm1990_vm4 = vcmp.eq.f32.partialorder %v962_v60, 8.507059e+37  ;;  %vm1994_vm5 = vcmp.eq.f32.partialorder %v917_v61, 8.507059e+37  ;;  %1474 = vrcp.f32 %v1983_v63  ;;  %vm1065_vm8 = vmor %vm1063_vm12, %vm1064_vm3  ;;  %v1123_v59 = vld [vmem:[#allocation2 + $0x28] sm:$0xff] }
 0x22f   : > { %v1473_v4 = vpop.eup %1472  ;;  %v1061_v5 = vmul.f32 %v1469_v28, %v1060_v37  ;;  %v909_v7 = vmul.f32 %v1471_v1, %v1947_v15  ;;  %vm914_vm7 = vweird.f32 %v1471_v1  ;;  %v807_v54 = vadd.f32 %v1916_v9, %v777_v27 }
 0x230   : > { %v1002_v8 = vadd.f32 %v1467_v24, %v1001_v2  ;;  %v954_v10 = vmul.f32 %v1473_v4, %v1951_v20  ;;  %v920_v21 = vor.u32 1.1754944e-38, %v919_v38  ;;  %1476 = vpow2.f32 %v1336_v3  ;;  %vm915_vm10 = vmor %vm913_vm0, %vm914_vm7 }
 0x231   : > { %v1062_v16 = vadd.f32 %v1469_v28, %v1061_v5  ;;  %v910_v53 = vsub.f32 1.0, %v909_v7  ;;  %vm959_vm9 = vweird.f32 %v1473_v4  ;;  %v902_v29 = vand.u32 2147483647, %v1983_v63  ;;  %v792_v7 = vpop.xlane.xlu2 %791 }
 0x232   : > { %v1006_v17 = vsel %vm1005_vm6, %v1467_v24, %v1002_v8  ;;  %v955_v19 = vsub.f32 1.0, %v954_v10  ;;  %v1335_v33 = vmul.f32 -1.442695, %v807_v54  ;;  %v809_v34 = vadd.f32 %v1916_v9, %v783_v13  ;;  %v771_v35 = vpop.xlane.xlu1 %770  ;;  %vm960_vm11 = vmor %vm958_vm15, %vm959_vm9 }
 0x233   : > { %v1011_v22 = vsel %vm1964_vm13, %v1010_v32, %v1006_v17  ;;  %v1066_v23 = vsel %vm1065_vm8, %v1469_v28, %v1062_v16  ;;  %v911_v62 = vmul.f32 %v1471_v1, %v910_v53  ;;  %v801_v36 = vadd.f32 %v1916_v9, %v759_v57  ;;  %v795_v17 = vpop.xlane.xlu0 %794 }
 0x234   : > { %v1142_v26 = vmul.f32 %v1126_v14, %v1011_v22  ;;  %v1071_v27 = vsel %vm1971_vm14, %v1070_v55, %v1066_v23  ;;  %v956_v24 = vmul.f32 %v1473_v4, %v955_v19  ;;  %v1475_v31 = vpop.eup %1474  ;;  %v804_v55 = vadd.f32 %v1916_v9, %v768_v25  ;;  %v1119_v14 = vld [vmem:[#allocation2 + $0x8] sm:$0xff] }
 0x235   : > { %v1146_v30 = vmul.f32 %v1130_v18, %v1071_v27  ;;  %v912_v0 = vadd.f32 %v1471_v1, %v911_v62  ;;  %v904_v61 = vand.u32 2147483648, %v1983_v63  ;;  %1478 = vpow2.f32 %v1335_v33 }
 0x236   : > { %v1158_v28 = vsub.f32 %v1142_v26, %v1785_v39  ;;  %v957_v32 = vadd.f32 %v1473_v4, %v956_v24  ;;  %v894_v39 = vmul.f32 %v1475_v31, %v1983_v63  ;;  %v1477_v37 = vpop.eup %1476  ;;  %v1337_v2 = vmul.f32 -1.442695, %v809_v34 }
 0x237   : > { %v1162_v58 = vsub.f32 %v1146_v30, %v1790_v40  ;;  %v916_v60 = vsel %vm915_vm10, %v1471_v1, %v912_v0  ;;  %v2032_v38 = vadd.f32 1.0, %v1477_v37  ;;  %v1329_v5 = vmul.f32 -1.442695, %v801_v36  ;;  %v1128_v37 = vld [vmem:[#allocation2 + $0x50] sm:$0xff] }
 0x238   : > { %1174 = vst.msk [vmem:[%s1692_s12 + $0x40] sm:$0xff] %vm567_vm1, %v1158_v28  ;;  %v961_v15 = vsel %vm960_vm11, %v1473_v4, %v957_v32  ;;  %v921_v57 = vsel %vm1994_vm5, %v920_v21, %v916_v60  ;;  %v895_v1 = vsub.f32 1.0, %v894_v39  ;;  %1480 = vpow2.f32 %v1337_v2 }
 0x239   : > { %1178 = vst.msk [vmem:[%s1692_s12 + $0x60] sm:$0xff] %vm567_vm1, %v1162_v58  ;;  %v966_v40 = vsel %vm1990_vm4, %v965_v6, %v961_v15  ;;  %v1136_v20 = vmul.f32 %v1120_v56, %v921_v57  ;;  %v1332_v4 = vmul.f32 -1.442695, %v804_v55  ;;  %vm899_vm12 = vweird.f32 %v1475_v31 }
 0x23a   : > { %v1139_v3 = vmul.f32 %v1123_v59, %v966_v40  ;;  %v896_v10 = vmul.f32 %v1475_v31, %v895_v1  ;;  %1482 = vrcp.f32 %v2032_v38  ;;  %vm898_vm13 = vweird.f32 %v1983_v63  ;;  %v789_v18 = vpop.xlane.xlu1 %788 }
 0x23b   : > { %v1152_v8 = vsub.f32 %v1136_v20, %v1819_v45  ;;  %1484 = vpow2.f32 %v1329_v5  ;;  %v812_v12 = vadd.f32 %v1916_v9, %v792_v7  ;;  %v1479_v13 = vpop.eup %1478  ;;  %vm900_vm14 = vmor %vm898_vm13, %vm899_vm12  ;;  %vm903_vm15 = vcmp.eq.f32.partialorder %v902_v29, 8.507059e+37 }
 0x23c   : > { %v1155_v11 = vsub.f32 %v1139_v3, %v1805_v43  ;;  %v897_v6 = vadd.f32 %v1475_v31, %v896_v10  ;;  %1486 = vpow2.f32 %v1332_v4  ;;  %v905_v45 = vor.u32 1.1754944e-38, %v904_v61 }
 0x23d   : > { %1168 = vst.msk [vmem:[%s1692_s12 + $0x10] sm:$0xff] %vm567_vm1, %v1152_v8  ;;  %v2043_v53 = vadd.f32 1.0, %v1479_v13  ;;  %v1340_v43 = vmul.f32 -1.442695, %v812_v12  ;;  %v805_v54 = vadd.f32 %v1916_v9, %v771_v35  ;;  %v1037_v23 = vand.u32 2147483647, %v2032_v38 }
 0x23e   : > { %1171 = vst.msk [vmem:[%s1692_s12 + $0x28] sm:$0xff] %vm567_vm1, %v1155_v11  ;;  %v901_v16 = vsel %vm900_vm14, %v1475_v31, %v897_v6  ;;  %v1481_v19 = vpop.eup %1480  ;;  %v1039_v62 = vand.u32 2147483648, %v2032_v38  ;;  %v813_v24 = vadd.f32 %v1916_v9, %v795_v17  ;;  %v811_v29 = vadd.f32 %v1916_v9, %v789_v18  ;;  %v1127_v18 = vld [vmem:[#allocation2 + $0x48] sm:$0xff] }
 0x23f   : > { %v906_v63 = vsel %vm903_vm15, %v905_v45, %v901_v16  ;;  %1488 = vrcp.f32 %v2043_v53  ;;  %v2050_v27 = vadd.f32 1.0, %v1481_v19  ;;  %v1333_v34 = vmul.f32 -1.442695, %v805_v54 }
 0x240   : > { %v1483_v21 = vpop.eup %1482  ;;  %v1135_v22 = vmul.f32 %v1119_v14, %v906_v63  ;;  %1490 = vpow2.f32 %v1340_v43  ;;  %v1022_v31 = vand.u32 2147483647, %v2043_v53  ;;  %vm1033_vm0 = vweird.f32 %v2032_v38 }
 0x241   : > { %v1485_v25 = vpop.eup %1484  ;;  %v1029_v26 = vmul.f32 %v1483_v21, %v2032_v38  ;;  %1492 = vrcp.f32 %v2050_v27  ;;  %v1024_v28 = vand.u32 2147483648, %v2043_v53  ;;  %vm1034_vm2 = vweird.f32 %v1483_v21 }
 0x242   : > { %v1487_v30 = vpop.eup %1486  ;;  %v1151_v0 = vsub.f32 %v1135_v22, %v1799_v41  ;;  %v2055_v33 = vadd.f32 1.0, %v1485_v25  ;;  %vm2064_vm3 = vcmp.eq.f32.partialorder %v1037_v23, 8.507059e+37  ;;  %v1040_v36 = vor.u32 1.1754944e-38, %v1039_v62  ;;  %vm1035_vm6 = vmor %vm1033_vm0, %vm1034_vm2 }
 0x243   : > { %v1030_v35 = vsub.f32 1.0, %v1029_v26  ;;  %v2068_v32 = vadd.f32 1.0, %v1487_v30  ;;  %v1341_v55 = vmul.f32 -1.442695, %v813_v24  ;;  %v2070_v58 = vmul.f32 -1.442695, %v811_v29 }
 0x244   : > { %1167 = vst.msk [vmem:[%s1692_s12 + $0x8] sm:$0xff] %vm567_vm1, %v1151_v0  ;;  %1494 = vrcp.f32 %v2055_v33  ;;  %vm1018_vm4 = vweird.f32 %v2043_v53  ;;  %vm2074_vm5 = vcmp.eq.f32.partialorder %v1022_v31, 8.507059e+37  ;;  %v1025_v15 = vor.u32 1.1754944e-38, %v1024_v28  ;;  %v1129_v24 = vld [vmem:[#allocation2 + $0x58] sm:$0xff] }
 0x245   : > { %v1031_v9 = vmul.f32 %v1483_v21, %v1030_v35  ;;  %v1489_v56 = vpop.eup %1488  ;;  %1496 = vpow2.f32 %v1333_v34  ;;  %vm1048_vm7 = vweird.f32 %v2050_v27  ;;  %v1052_v57 = vand.u32 2147483647, %v2050_v27  ;;  %v1121_v35 = vld [vmem:[#allocation2 + $0x18] sm:$0xff] }
 0x246   : > { %v1014_v60 = vmul.f32 %v1489_v56, %v2043_v53  ;;  %v1491_v61 = vpop.eup %1490  ;;  %1498 = vrcp.f32 %v2068_v32  ;;  %v1054_v1 = vand.u32 2147483648, %v2050_v27  ;;  %vm928_vm8 = vweird.f32 %v2055_v33 }
 0x247   : > { %v1032_v59 = vadd.f32 %v1483_v21, %v1031_v9  ;;  %v1493_v2 = vpop.eup %1492  ;;  %v2084_v3 = vadd.f32 1.0, %v1491_v61  ;;  %v932_v7 = vand.u32 2147483647, %v2055_v33  ;;  %vm1019_vm9 = vweird.f32 %v1489_v56  ;;  %v1124_v61 = vld [vmem:[#allocation2 + $0x30] sm:$0xff] }
 0x248   : > { %v1015_v20 = vsub.f32 1.0, %v1014_v60  ;;  %v1044_v38 = vmul.f32 %v1493_v2, %v2050_v27  ;;  %vm2092_vm10 = vcmp.eq.f32.partialorder %v1052_v57, 8.507059e+37  ;;  %v934_v14 = vand.u32 2147483648, %v2055_v33  ;;  %vm1020_vm11 = vmor %vm1018_vm4, %vm1019_vm9 }
 0x249   : > { %v1036_v40 = vsel %vm1035_vm6, %v1483_v21, %v1032_v59  ;;  %1500 = vrcp.f32 %v2084_v3  ;;  %v1055_v43 = vor.u32 1.1754944e-38, %v1054_v1  ;;  %vm1049_vm12 = vweird.f32 %v1493_v2 }
 0x24a   : > { %v1495_v5 = vpop.eup %1494  ;;  %v1041_v4 = vsel %vm2064_vm3, %v1040_v36, %v1036_v40  ;;  %v1016_v10 = vmul.f32 %v1489_v56, %v1015_v20  ;;  %v1045_v12 = vsub.f32 1.0, %v1044_v38  ;;  %1502 = vpow2.f32 %v1341_v55  ;;  %vm1050_vm14 = vmor %vm1048_vm7, %vm1049_vm12 }
 0x24b   : > { %v1144_v8 = vmul.f32 %v1128_v37, %v1041_v4  ;;  %v924_v11 = vmul.f32 %v1495_v5, %v2055_v33  ;;  %v1497_v6 = vpop.eup %1496  ;;  %vm929_vm13 = vweird.f32 %v1495_v5  ;;  %v977_v25 = vand.u32 2147483647, %v2068_v32 }
 0x24c   : > { %v1017_v16 = vadd.f32 %v1489_v56, %v1016_v10  ;;  %v1499_v17 = vpop.eup %1498  ;;  %v1046_v19 = vmul.f32 %v1493_v2, %v1045_v12  ;;  %v2101_v63 = vadd.f32 1.0, %v1497_v6  ;;  %v979_v53 = vand.u32 2147483648, %v2068_v32  ;;  %vm930_vm15 = vmor %vm928_vm8, %vm929_vm13 }
 0x24d   : > { %v1160_v45 = vsub.f32 %v1144_v8, %v1822_v46  ;;  %v925_v54 = vsub.f32 1.0, %v924_v11  ;;  %v969_v46 = vmul.f32 %v1499_v17, %v2068_v32  ;;  %vm933_vm0 = vcmp.eq.f32.partialorder %v932_v7, 8.507059e+37  ;;  %v1132_v7 = vld [vmem:[#allocation2 + $0x70] sm:$0xff] }
 0x24e   : > { %v1021_v21 = vsel %vm1020_vm11, %v1489_v56, %v1017_v16  ;;  %v1047_v62 = vadd.f32 %v1493_v2, %v1046_v19  ;;  %1504 = vrcp.f32 %v2101_v63  ;;  %v935_v31 = vor.u32 1.1754944e-38, %v934_v14 }
 0x24f   : > { %1176 = vst.msk [vmem:[%s1692_s12 + $0x50] sm:$0xff] %vm567_vm1, %v1160_v45  ;;  %v926_v22 = vmul.f32 %v1495_v5, %v925_v54  ;;  %v1026_v23 = vsel %vm2074_vm5, %v1025_v15, %v1021_v21  ;;  %v970_v30 = vsub.f32 1.0, %v969_v46  ;;  %v1501_v0 = vpop.eup %1500  ;;  %vm974_vm2 = vweird.f32 %v1499_v17 }
 0x250   : > { %v1143_v26 = vmul.f32 %v1127_v18, %v1026_v23  ;;  %v1051_v34 = vsel %vm1050_vm14, %v1493_v2, %v1047_v62  ;;  %v1503_v56 = vpop.eup %1502  ;;  %vm973_vm3 = vweird.f32 %v2068_v32  ;;  %v1089_v59 = vmul.f32 %v1501_v0, %v2084_v3 }
 0x251   : > { %v927_v29 = vadd.f32 %v1495_v5, %v926_v22  ;;  %v1056_v27 = vsel %vm2092_vm10, %v1055_v43, %v1051_v34  ;;  %v971_v41 = vmul.f32 %v1499_v17, %v970_v30  ;;  %vm978_vm4 = vcmp.eq.f32.partialorder %v977_v25, 8.507059e+37  ;;  %vm975_vm5 = vmor %vm973_vm3, %vm974_vm2  ;;  %v1125_v43 = vld [vmem:[#allocation2 + $0x38] sm:$0xff] }
 0x252   : > { %v1159_v28 = vsub.f32 %v1143_v26, %v1802_v42  ;;  %v1145_v36 = vmul.f32 %v1129_v24, %v1056_v27  ;;  %v980_v39 = vor.u32 1.1754944e-38, %v979_v53  ;;  %v1090_v37 = vsub.f32 1.0, %v1089_v59  ;;  %v1133_v24 = vld [vmem:[#allocation2 + $0x78] sm:$0xff] }
 0x253   : > { %v931_v9 = vsel %vm930_vm15, %v1495_v5, %v927_v29  ;;  %v972_v60 = vadd.f32 %v1499_v17, %v971_v41  ;;  %v2125_v15 = vadd.f32 1.0, %v1503_v56  ;;  %1506 = vpow2.f32 %v2070_v58  ;;  %v1131_v41 = vld [vmem:[#allocation2 + $0x68] sm:$0xff] }
 0x254   : > { %v936_v55 = vsel %vm933_vm0, %v935_v31, %v931_v9  ;;  %1175 = vst.msk [vmem:[%s1692_s12 + $0x48] sm:$0xff] %vm567_vm1, %v1159_v28  ;;  %v1161_v42 = vsub.f32 %v1145_v36, %v1842_v50  ;;  %v1505_v32 = vpop.eup %1504  ;;  %v1097_v40 = vand.u32 2147483647, %v2084_v3  ;;  %v1099_v20 = vand.u32 2147483648, %v2084_v3 }
 0x255   : > { %v1137_v33 = vmul.f32 %v1121_v35, %v936_v55  ;;  %v976_v2 = vsel %vm975_vm5, %v1499_v17, %v972_v60  ;;  %v1091_v1 = vmul.f32 %v1501_v0, %v1090_v37  ;;  %vm1094_vm6 = vweird.f32 %v1501_v0 }
 0x256   : > { %1177 = vst.msk [vmem:[%s1692_s12 + $0x58] sm:$0xff] %vm567_vm1, %v1161_v42  ;;  %v981_v50 = vsel %vm978_vm4, %v980_v39, %v976_v2  ;;  %v984_v5 = vmul.f32 %v1505_v32, %v2101_v63  ;;  %1508 = vrcp.f32 %v2125_v15  ;;  %vm1093_vm7 = vweird.f32 %v2084_v3 }
 0x257   : > { %v1153_v57 = vsub.f32 %v1137_v33, %v1839_v49  ;;  %v1140_v4 = vmul.f32 %v1124_v61, %v981_v50  ;;  %v1092_v58 = vadd.f32 %v1501_v0, %v1091_v1  ;;  %vm1095_vm8 = vmor %vm1093_vm7, %vm1094_vm6  ;;  %vm1098_vm9 = vcmp.eq.f32.partialorder %v1097_v40, 8.507059e+37 }
 0x258   : > { %v985_v49 = vsub.f32 1.0, %v984_v5  ;;  %v1100_v8 = vor.u32 1.1754944e-38, %v1099_v20  ;;  %v994_v10 = vand.u32 2147483648, %v2101_v63  ;;  %vm989_vm10 = vweird.f32 %v1505_v32 }
 0x259   : > { %1169 = vst.msk [vmem:[%s1692_s12 + $0x18] sm:$0xff] %vm567_vm1, %v1153_v57  ;;  %v1156_v38 = vsub.f32 %v1140_v4, %v1825_v47  ;;  %v1507_v11 = vpop.eup %1506  ;;  %v1096_v6 = vsel %vm1095_vm8, %v1501_v0, %v1092_v58  ;;  %v992_v13 = vand.u32 2147483647, %v2101_v63  ;;  %vm988_vm11 = vweird.f32 %v2101_v63 }
 0x25a   : > { %v986_v12 = vmul.f32 %v1505_v32, %v985_v49  ;;  %v1101_v14 = vsel %vm1098_vm9, %v1100_v8, %v1096_v6  ;;  %v875_v3 = vadd.f32 1.0, %v1507_v11  ;;  %vm990_vm12 = vmor %vm988_vm11, %vm989_vm10  ;;  %v995_v54 = vor.u32 1.1754944e-38, %v994_v10 }
 0x25b   : > { %1172 = vst.msk [vmem:[%s1692_s12 + $0x30] sm:$0xff] %vm567_vm1, %v1156_v38  ;;  %v1148_v45 = vmul.f32 %v1132_v7, %v1101_v14  ;;  %vm993_vm13 = vcmp.eq.f32.partialorder %v992_v13, 8.507059e+37  ;;  %vm1108_vm14 = vweird.f32 %v2125_v15  ;;  %v1114_v63 = vand.u32 2147483648, %v2125_v15 }
 0x25c   : > { %v987_v16 = vadd.f32 %v1505_v32, %v986_v12  ;;  %v1509_v47 = vpop.eup %1508  ;;  %1510 = vrcp.f32 %v875_v3  ;;  %v1112_v25 = vand.u32 2147483647, %v2125_v15  ;;  %v1084_v35 = vand.u32 2147483648, %v875_v3 }
 0x25d   : > { %v1164_v17 = vsub.f32 %v1148_v45, %v1830_v48  ;;  %v1104_v19 = vmul.f32 %v1509_v47, %v2125_v15  ;;  %vm1109_vm15 = vweird.f32 %v1509_v47  ;;  %v1115_v29 = vor.u32 1.1754944e-38, %v1114_v63 }
 0x25e   : > { %v991_v18 = vsel %vm990_vm12, %v1505_v32, %v987_v16  ;;  %vm1110_vm0 = vmor %vm1108_vm14, %vm1109_vm15  ;;  %vm1113_vm2 = vcmp.eq.f32.partialorder %v1112_v25, 8.507059e+37  ;;  %v1082_v28 = vand.u32 2147483647, %v875_v3  ;;  %vm1078_vm4 = vweird.f32 %v875_v3 }
 0x25f   : > { %v996_v21 = vsel %vm993_vm13, %v995_v54, %v991_v18  ;;  %1180 = vst.msk [vmem:[%s1692_s12 + $0x70] sm:$0xff] %vm567_vm1, %v1164_v17  ;;  %v1105_v46 = vsub.f32 1.0, %v1104_v19  ;;  %v1085_v56 = vor.u32 1.1754944e-38, %v1084_v35 }
 0x260   : > { %v1141_v22 = vmul.f32 %v1125_v43, %v996_v21  ;;  %vm1083_vm6 = vcmp.eq.f32.partialorder %v1082_v28, 8.507059e+37 }
 0x261   : > { %v1106_v62 = vmul.f32 %v1509_v47, %v1105_v46 }
 0x262   : > { %v1157_v23 = vsub.f32 %v1141_v22, %v1845_v51  ;;  %v1511_v48 = vpop.eup %1510 }
 0x263   : > { %v1107_v53 = vadd.f32 %v1509_v47, %v1106_v62  ;;  %v1074_v26 = vmul.f32 %v1511_v48, %v875_v3  ;;  %vm1079_vm3 = vweird.f32 %v1511_v48 }
 0x264   : > { %1173 = vst.msk [vmem:[%s1692_s12 + $0x38] sm:$0xff] %vm567_vm1, %v1157_v23  ;;  %vm1080_vm5 = vmor %vm1078_vm4, %vm1079_vm3 }
 0x265   : > { %v1111_v30 = vsel %vm1110_vm0, %v1509_v47, %v1107_v53  ;;  %v1075_v0 = vsub.f32 1.0, %v1074_v26 }
 0x266   : > { %v1116_v34 = vsel %vm1113_vm2, %v1115_v29, %v1111_v30 }
 0x267   : > { %v1149_v31 = vmul.f32 %v1133_v24, %v1116_v34  ;;  %v1076_v51 = vmul.f32 %v1511_v48, %v1075_v0 }
 0x269   : > { %v1165_v27 = vsub.f32 %v1149_v31, %v1850_v52  ;;  %v1077_v9 = vadd.f32 %v1511_v48, %v1076_v51 }
 0x26b   : > { %1181 = vst.msk [vmem:[%s1692_s12 + $0x78] sm:$0xff] %vm567_vm1, %v1165_v27  ;;  %v1081_v36 = vsel %vm1080_vm5, %v1511_v48, %v1077_v9 }
 0x26c   : > { %v1086_v55 = vsel %vm1083_vm6, %v1085_v56, %v1081_v36 }
 0x26d   : > { %v1147_v59 = vmul.f32 %v1131_v41, %v1086_v55 }
 0x26f   : > { %v1163_v33 = vsub.f32 %v1147_v59, %v1810_v44 }
 0x271   : > { %1179 = vst.msk [vmem:[%s1692_s12 + $0x68] sm:$0xff] %vm567_vm1, %v1163_v33 }
 0x272 PF: > { %s17_s29 = sadd.s32 1, %s1566_s29   ;;  %s2208_s23 = smov %s1546_s24 }
 0x273   : > { %p14_p13 = scmp.ge.s32.totalorder %s17_s29, 6   ;;  %s2209_s24 = smov %s1658_s11 }
 0x274   : > { %s2210_s25 = smov %s1558_s27  ;;  %s2211_s26 = smov %s1562_s28 }
 0x275   : > { %s2212_s27 = smov %s2215_s5  ;;  %s2213_s28 = smov %s2219_s30 }
 0x276   :  { %16 = sbr.rel (!%p14_p13) target bundleno = 6 (0x6), region = 130 }

</bundles_post_ra>
